<compile_context>
chip_gen: v6e
topology: v6e:2x2x1
jax: 0.10.0
libtpu: 0.0.40
codegen_flags: <defaults>
</compile_context>

<pallas_src>
import functools

import jax
import jax.numpy as jnp
import numpy as np
from jax.experimental import pallas as pl
from jax.experimental.pallas import tpu as pltpu


# ---------------- kernel ----------------
def _decoder_gumbel_kernel(x_ref, vars_ref, o_ref, *, groups, num_vars, var_dim):
    """Grouped codebook matmul, fully resident in VMEM.

    x_ref    : (B*T, groups*num_vars)      per-group code scores
    vars_ref : (groups, num_vars, var_dim) codebook
    o_ref    : (B*T, groups*var_dim)       quantized output
    """
    x = x_ref[...]
    # Static per-group loop: with num_vars = var_dim = 128 every slice is
    # 128-lane aligned, so there is no relayout; each group is one MXU push
    # followed by an unmasked (B*T, 128) store.
    for g in range(groups):
        xg = x[:, g * num_vars:(g + 1) * num_vars]
        o_ref[:, g * var_dim:(g + 1) * var_dim] = jnp.dot(
            xg, vars_ref[g], preferred_element_type=jnp.float32)


# ---------------- wrapper ----------------
def decoder_gumbel_forward(x, codebook_vars, *, groups, num_vars, combine_groups):
    """Mirrors DecoderGumbel.forward (returns result['x'])."""
    bsz, tsz, fsz = x.shape
    assert fsz == groups * num_vars

    v = codebook_vars[0]                       # (num_groups*num_vars, var_dim)
    if combine_groups:                         # parameter prep (done once)
        v = jnp.tile(v, (groups, 1))
    var_dim = v.shape[-1]
    v = v.reshape(groups, num_vars, var_dim)

    bt = bsz * tsz
    x2 = x.reshape(bt, fsz)

    out = pl.pallas_call(
        functools.partial(_decoder_gumbel_kernel, groups=groups,
                          num_vars=num_vars, var_dim=var_dim),
        grid=(1,),
        in_specs=[
            pl.BlockSpec((bt, groups * num_vars), lambda i: (0, 0)),
            pl.BlockSpec((groups, num_vars, var_dim), lambda i: (0, 0, 0)),
        ],
        out_specs=pl.BlockSpec((bt, groups * var_dim), lambda i: (0, 0)),
        out_shape=jax.ShapeDtypeStruct((bt, groups * var_dim), jnp.float32),
        compiler_params=pltpu.CompilerParams(
            dimension_semantics=("arbitrary",)),
    )(x2, v)

    return out.reshape(bsz, tsz, groups * var_dim)


# ---------------- main ----------------
if __name__ == "__main__":
    key = jax.random.PRNGKey(0)
    k_vars, k_logits = jax.random.split(key)

    # Small, concrete config (wav2vec2-style, scaled down / lane-aligned):
    GROUPS = 2
    NUM_VARS = 128
    VQ_DIM = 256
    VAR_DIM = VQ_DIM // GROUPS
    COMBINE_GROUPS = False
    BSZ, TSZ = 2, 8

    # Codebook: nn.init.uniform_ -> U[0, 1)
    codebook_vars = jax.random.uniform(
        k_vars, (1, GROUPS * NUM_VARS, VAR_DIM), jnp.float32)

    # Eval-style input: one-hot code per group (what the parent quantizer
    # produces at inference), flattened to (bsz, tsz, groups*num_vars).
    logits = jax.random.normal(k_logits, (BSZ, TSZ, GROUPS, NUM_VARS), jnp.float32)
    idx = jnp.argmax(logits, axis=-1)
    x = jax.nn.one_hot(idx, NUM_VARS, dtype=jnp.float32).reshape(
        BSZ, TSZ, GROUPS * NUM_VARS)

    out = decoder_gumbel_forward(
        x, codebook_vars, groups=GROUPS, num_vars=NUM_VARS,
        combine_groups=COMBINE_GROUPS)
    out = jax.block_until_ready(out)
    assert out.shape == (BSZ, TSZ, VQ_DIM)

    # ----- numpy reference mirroring the PyTorch forward exactly -----
    xn = np.asarray(x, dtype=np.float32)
    vn = np.asarray(codebook_vars, dtype=np.float32)[0]
    if COMBINE_GROUPS:
        vn = np.tile(vn, (GROUPS, 1))
    xr = xn.reshape(BSZ * TSZ, GROUPS, NUM_VARS).transpose(1, 0, 2)   # (G,BT,V)
    vr = vn.reshape(GROUPS, NUM_VARS, VAR_DIM)                        # (G,V,D)
    ref = np.matmul(xr, vr).transpose(1, 0, 2).reshape(BSZ, TSZ, VQ_DIM)

    np.testing.assert_allclose(np.asarray(out), ref, atol=1e-2, rtol=1e-2)
    print("KERNEL_OK")
</pallas_src>

<mosaic_0001>
module attributes {stable_mosaic.version = 11 : i64} {
  func.func @_decoder_gumbel_kernel(%arg0: i32, %arg1: memref<16x256xf32, #tpu.memory_space<vmem>>, %arg2: memref<2x128x128xf32, #tpu.memory_space<vmem>>, %arg3: memref<16x256xf32, #tpu.memory_space<vmem>>) attributes {dimension_semantics = [#tpu.dimension_semantics<arbitrary>], iteration_bounds = array<i64: 1>, scalar_prefetch = 0 : i64, scratch_operands = 0 : i64, tpu.core_type = #tpu.core_type<tc>, window_params = [{pipeline_mode = #tpu.pipeline_mode<synchronous>, transform_indices = @transform_0, window_bounds = array<i64: 16, 256>}, {pipeline_mode = #tpu.pipeline_mode<synchronous>, transform_indices = @transform_1, window_bounds = array<i64: 2, 128, 128>}, {pipeline_mode = #tpu.pipeline_mode<synchronous>, transform_indices = @transform_2, window_bounds = array<i64: 16, 256>}]} {
    %c0 = arith.constant 0 : index
    %c0_0 = arith.constant 0 : index
    %0 = vector.load %arg1[%c0, %c0_0] : memref<16x256xf32, #tpu.memory_space<vmem>>, vector<16x256xf32>
    %1 = vector.extract_strided_slice %0 {offsets = [0, 0], sizes = [16, 128], strides = [1, 1]} : vector<16x256xf32> to vector<16x128xf32>
    %c0_1 = arith.constant 0 : index
    %c0_2 = arith.constant 0 : index
    %c0_3 = arith.constant 0 : index
    %2 = vector.load %arg2[%c0_1, %c0_2, %c0_3] : memref<2x128x128xf32, #tpu.memory_space<vmem>>, vector<1x128x128xf32>
    %3 = vector.shape_cast %2 : vector<1x128x128xf32> to vector<128x128xf32>
    %cst = arith.constant dense<0.000000e+00> : vector<16x128xf32>
    %4 = tpu.matmul %1, %3, %cst {dimension_numbers = #tpu.dot_dimension_numbers<[1], [0], [0], [1], [0, 0, 1, 1], [], []>} : vector<16x128xf32>, vector<128x128xf32>, vector<16x128xf32> -> vector<16x128xf32>
    %c0_4 = arith.constant 0 : index
    %c0_5 = arith.constant 0 : index
    %5 = vector.load %arg3[%c0_4, %c0_5] : memref<16x256xf32, #tpu.memory_space<vmem>>, vector<16x128xf32>
    tpu.vector_store %arg3[%c0_4, %c0_5], %4 {strides = array<i32>} : memref<16x256xf32, #tpu.memory_space<vmem>>, vector<16x128xf32>,
    %6 = vector.extract_strided_slice %0 {offsets = [0, 128], sizes = [16, 128], strides = [1, 1]} : vector<16x256xf32> to vector<16x128xf32>
    %c1 = arith.constant 1 : index
    %c0_6 = arith.constant 0 : index
    %c0_7 = arith.constant 0 : index
    %7 = vector.load %arg2[%c1, %c0_6, %c0_7] : memref<2x128x128xf32, #tpu.memory_space<vmem>>, vector<1x128x128xf32>
    %8 = vector.shape_cast %7 : vector<1x128x128xf32> to vector<128x128xf32>
    %cst_8 = arith.constant dense<0.000000e+00> : vector<16x128xf32>
    %9 = tpu.matmul %6, %8, %cst_8 {dimension_numbers = #tpu.dot_dimension_numbers<[1], [0], [0], [1], [0, 0, 1, 1], [], []>} : vector<16x128xf32>, vector<128x128xf32>, vector<16x128xf32> -> vector<16x128xf32>
    %c0_9 = arith.constant 0 : index
    %c128 = arith.constant 128 : index
    %10 = vector.load %arg3[%c0_9, %c128] : memref<16x256xf32, #tpu.memory_space<vmem>>, vector<16x128xf32>
    tpu.vector_store %arg3[%c0_9, %c128], %9 {strides = array<i32>} : memref<16x256xf32, #tpu.memory_space<vmem>>, vector<16x128xf32>,
    return
  }
  func.func @transform_0(%arg0: i32) -> (i32, i32) {
    %c0_i32 = arith.constant 0 : i32
    %c0_i32_0 = arith.constant 0 : i32
    %c0_i32_1 = arith.constant 0 : i32
    return %c0_i32, %c0_i32_0 : i32, i32
  }
  func.func @transform_1(%arg0: i32) -> (i32, i32, i32) {
    %c0_i32 = arith.constant 0 : i32
    %c0_i32_0 = arith.constant 0 : i32
    %c0_i32_1 = arith.constant 0 : i32
    %c0_i32_2 = arith.constant 0 : i32
    return %c0_i32, %c0_i32_0, %c0_i32_1 : i32, i32, i32
  }
  func.func @transform_2(%arg0: i32) -> (i32, i32) {
    %c0_i32 = arith.constant 0 : i32
    %c0_i32_0 = arith.constant 0 : i32
    %c0_i32_1 = arith.constant 0 : i32
    return %c0_i32, %c0_i32_0 : i32, i32
  }
}

</mosaic_0001>

<bundles_post_ra>
// kernel: tpu_custom_call.1
= control target key start
LH: loop header
LB: loop body
LE: loop exit
PB: predicated region body
PF: predicated region fallthrough
CT: control target
= control target key end

     0   :  { %7 = vsyncpa [#allocation3], 0  ;;  %s465_s0 = inlined_call_operand.hbm [shape: f32[16,256], index: 0, kind: input, shape index: {}]   ;;  %s466_s1 = inlined_call_operand.hbm [shape: f32[2,128,128], index: 1, kind: input, shape index: {}]   ;;  %s467_s2 = inlined_call_operand.hbm [shape: f32[16,256], index: 2, kind: output, shape index: {}]  }
   0x1   :  { %8 = vsyncpa [#allocation6], 0 }
   0x2   :  { %9 = vsyncpa [#allocation4], 0  ;;  %s428_s9 = smov [#allocation2]  }
   0x3   :  { %s15_s10 = sshll.u32 %s428_s9, 4  ;;  %s16_s10 = int_to_ptr.vmem [resolvable:$true] %s15_s10 }
   0x4   :  { %s370_s11 = scalar_lea.vmem %s16_s10, 512  ;;  %p375_p1 = scmp.lt.s32.totalorder %s16_s10, %s16_s10 }
   0x5   :  { %p371_p0 = scmp.ne.s32.totalorder %s16_s10, %s370_s11  ;;  %p376_p2 = scmp.lt.s32.totalorder %s370_s11, %s370_s11 }
   0x7   :  { %p377_p3 = por %p376_p2, %p375_p1 }
   0x9   :  { %p378_p4 = pnand %p377_p3, %p371_p0 }
   0xb   :  { %381 = shalt.err (!%p378_p4)
}
   0xc   :  { %s429_s12 = smov 256   ;;  %s430_s13 = smov 16  }
   0xd   :  { %21 = dma.hbm_to_vmem [thread:$0]  %s465_s0, 512, %s16_s10, [#allocation3], %s429_s12, %s429_s12, %s430_s13  }
   0xe   :  { %s431_s16 = smov [#allocation5]  }
   0xf   :  { %s27_s17 = sshll.u32 %s431_s16, 4  ;;  %s28_s17 = int_to_ptr.vmem [resolvable:$true] %s27_s17 }
  0x10   :  { %s390_s18 = scalar_lea.vmem %s28_s17, 4096  ;;  %p395_p6 = scmp.lt.s32.totalorder %s28_s17, %s28_s17 }
  0x11   :  { %p391_p5 = scmp.ne.s32.totalorder %s28_s17, %s390_s18  ;;  %p396_p7 = scmp.lt.s32.totalorder %s390_s18, %s390_s18 }
  0x13   :  { %p397_p8 = por %p396_p7, %p395_p6 }
  0x15   :  { %p398_p9 = pnand %p397_p8, %p391_p5 }
  0x17   :  { %401 = shalt.err (!%p398_p9)
}
  0x18   :  { %s432_s19 = smov 128   ;;  %s433_s20 = smov 8  }
  0x19   :  { %33 = dma.hbm_to_vmem [thread:$0]  %s466_s1, 4096, %s28_s17, [#allocation6], %s432_s19, %s432_s19, %s433_s20  }
  0x1a   :  { %422 = dma.done.wait [#allocation3], 512  }
  0x1b   :  { %423 = vsyncadd [#allocation3], 4294966784 }
  0x1c   :  { %424 = dma.done.wait [#allocation6], 4096  }
  0x1d   :  { %425 = vsyncadd [#allocation6], 4294963200  ;;  %v59_v0 = vld [vmem:[#allocation5 + $0x78] sm:$0xff]  ;;  %v58_v2 = vld [vmem:[#allocation5 + $0x70] sm:$0xff]  ;;  %s434_s0 = smov [#allocation7]  }
  0x1e   :  { %v153_v1 = vld [vmem:[#allocation5 + $0xf8] sm:$0xff]  ;;  %285 = vmatprep.subr.mxu0 %v59_v0  ;;  %v152_v3 = vld [vmem:[#allocation5 + $0xf0] sm:$0xff]  ;;  %v57_v4 = vld [vmem:[#allocation5 + $0x68] sm:$0xff]  ;;  %s236_s1 = sshll.u32 %s434_s0, 4  ;;  %s237_s1 = int_to_ptr.vmem [resolvable:$true] %s236_s1 }
  0x1f   :  { %320 = vmatprep.subr.mxu1 %v153_v1  ;;  %286 = vmatpush3.msra.mxu0 %v59_v0  ;;  %v151_v5 = vld [vmem:[#allocation5 + $0xe8] sm:$0xff]  ;;  %v56_v6 = vld [vmem:[#allocation5 + $0x60] sm:$0xff]  ;;  %v55_v8 = vld [vmem:[#allocation5 + $0x58] sm:$0xff]  ;;  %s402_s23 = scalar_lea.vmem %s237_s1, 512  ;;  %p407_p11 = scmp.lt.s32.totalorder %s237_s1, %s237_s1 }
  0x20   :  { %321 = vmatpush3.msra.mxu1 %v153_v1  ;;  %287 = vmatprep.subr.mxu0 %v58_v2  ;;  %v150_v7 = vld [vmem:[#allocation5 + $0xe0] sm:$0xff]  ;;  %v149_v9 = vld [vmem:[#allocation5 + $0xd8] sm:$0xff]  ;;  %v54_v10 = vld [vmem:[#allocation5 + $0x50] sm:$0xff]  ;;  %p403_p10 = scmp.ne.s32.totalorder %s237_s1, %s402_s23  ;;  %p408_p12 = scmp.lt.s32.totalorder %s402_s23, %s402_s23 }
  0x21   :  { %322 = vmatprep.subr.mxu1 %v152_v3  ;;  %288 = vmatpush3.msra.mxu0 %v58_v2  ;;  %v148_v11 = vld [vmem:[#allocation5 + $0xd0] sm:$0xff]  ;;  %v53_v12 = vld [vmem:[#allocation5 + $0x48] sm:$0xff]  ;;  %v52_v14 = vld [vmem:[#allocation5 + $0x40] sm:$0xff] }
  0x22   :  { %323 = vmatpush3.msra.mxu1 %v152_v3  ;;  %289 = vmatprep.subr.mxu0 %v57_v4  ;;  %v147_v13 = vld [vmem:[#allocation5 + $0xc8] sm:$0xff]  ;;  %v146_v15 = vld [vmem:[#allocation5 + $0xc0] sm:$0xff]  ;;  %v51_v16 = vld [vmem:[#allocation5 + $0x38] sm:$0xff]  ;;  %p409_p13 = por %p408_p12, %p407_p11 }
  0x23   :  { %324 = vmatprep.subr.mxu1 %v151_v5  ;;  %290 = vmatpush3.msra.mxu0 %v57_v4  ;;  %v145_v17 = vld [vmem:[#allocation5 + $0xb8] sm:$0xff]  ;;  %v50_v18 = vld [vmem:[#allocation5 + $0x30] sm:$0xff]  ;;  %v49_v20 = vld [vmem:[#allocation5 + $0x28] sm:$0xff] }
  0x24   :  { %325 = vmatpush3.msra.mxu1 %v151_v5  ;;  %291 = vmatprep.subr.mxu0 %v56_v6  ;;  %v144_v19 = vld [vmem:[#allocation5 + $0xb0] sm:$0xff]  ;;  %v143_v21 = vld [vmem:[#allocation5 + $0xa8] sm:$0xff]  ;;  %v48_v22 = vld [vmem:[#allocation5 + $0x20] sm:$0xff]  ;;  %p410_p0 = pnand %p409_p13, %p403_p10 }
  0x25   :  { %326 = vmatprep.subr.mxu1 %v150_v7  ;;  %292 = vmatpush3.msra.mxu0 %v56_v6  ;;  %v142_v23 = vld [vmem:[#allocation5 + $0xa0] sm:$0xff]  ;;  %v47_v24 = vld [vmem:[#allocation5 + $0x18] sm:$0xff]  ;;  %v46_v26 = vld [vmem:[#allocation5 + $0x10] sm:$0xff] }
  0x26   :  { %327 = vmatpush3.msra.mxu1 %v150_v7  ;;  %293 = vmatprep.subr.mxu0 %v55_v8  ;;  %v141_v25 = vld [vmem:[#allocation5 + $0x98] sm:$0xff]  ;;  %v140_v27 = vld [vmem:[#allocation5 + $0x90] sm:$0xff]  ;;  %v45_v28 = vld [vmem:[#allocation5 + $0x8] sm:$0xff] }
  0x27   :  { %328 = vmatprep.subr.mxu1 %v149_v9  ;;  %294 = vmatpush3.msra.mxu0 %v55_v8  ;;  %v139_v29 = vld [vmem:[#allocation5 + $0x88] sm:$0xff]  ;;  %v44_v30 = vld [vmem:[#allocation5] sm:$0xff]  ;;  %v42_v34 = vld [vmem:[#allocation2 + $0x10] sm:$0xff] }
  0x28   :  { %329 = vmatpush3.msra.mxu1 %v149_v9  ;;  %295 = vmatprep.subr.mxu0 %v54_v10  ;;  %v138_v31 = vld [vmem:[#allocation5 + $0x80] sm:$0xff]  ;;  %v41_v33 = vld [vmem:[#allocation2 + $0x8] sm:$0xff]  ;;  %v43_v35 = vld [vmem:[#allocation2 + $0x18] sm:$0xff] }
  0x29   :  { %330 = vmatprep.subr.mxu1 %v148_v11  ;;  %296 = vmatpush3.msra.mxu0 %v54_v10  ;;  %v40_v32 = vld [vmem:[#allocation2] sm:$0xff] }
  0x2a   :  { %331 = vmatpush3.msra.mxu1 %v148_v11  ;;  %297 = vmatprep.subr.mxu0 %v53_v12 }
  0x2b   :  { %332 = vmatprep.subr.mxu1 %v147_v13  ;;  %298 = vmatpush3.msra.mxu0 %v53_v12 }
  0x2c   :  { %333 = vmatpush3.msra.mxu1 %v147_v13  ;;  %299 = vmatprep.subr.mxu0 %v52_v14 }
  0x2d   :  { %334 = vmatprep.subr.mxu1 %v146_v15  ;;  %300 = vmatpush3.msra.mxu0 %v52_v14 }
  0x2e   :  { %335 = vmatpush3.msra.mxu1 %v146_v15  ;;  %301 = vmatprep.subr.mxu0 %v51_v16 }
  0x2f   :  { %336 = vmatprep.subr.mxu1 %v145_v17  ;;  %302 = vmatpush3.msra.mxu0 %v51_v16 }
  0x30   :  { %337 = vmatpush3.msra.mxu1 %v145_v17  ;;  %303 = vmatprep.subr.mxu0 %v50_v18 }
  0x31   :  { %338 = vmatprep.subr.mxu1 %v144_v19  ;;  %304 = vmatpush3.msra.mxu0 %v50_v18 }
  0x32   :  { %339 = vmatpush3.msra.mxu1 %v144_v19  ;;  %305 = vmatprep.subr.mxu0 %v49_v20 }
  0x33   :  { %340 = vmatprep.subr.mxu1 %v143_v21  ;;  %306 = vmatpush3.msra.mxu0 %v49_v20 }
  0x34   :  { %341 = vmatpush3.msra.mxu1 %v143_v21  ;;  %307 = vmatprep.subr.mxu0 %v48_v22 }
  0x35   :  { %342 = vmatprep.subr.mxu1 %v142_v23  ;;  %308 = vmatpush3.msra.mxu0 %v48_v22 }
  0x36   :  { %343 = vmatpush3.msra.mxu1 %v142_v23  ;;  %309 = vmatprep.subr.mxu0 %v47_v24 }
  0x37   :  { %344 = vmatprep.subr.mxu1 %v141_v25  ;;  %310 = vmatpush3.msra.mxu0 %v47_v24 }
  0x38   :  { %345 = vmatpush3.msra.mxu1 %v141_v25  ;;  %311 = vmatprep.subr.mxu0 %v46_v26 }
  0x39   :  { %346 = vmatprep.subr.mxu1 %v140_v27  ;;  %312 = vmatpush3.msra.mxu0 %v46_v26 }
  0x3a   :  { %347 = vmatpush3.msra.mxu1 %v140_v27  ;;  %313 = vmatprep.subr.mxu0 %v45_v28 }
  0x3b   :  { %348 = vmatprep.subr.mxu1 %v139_v29  ;;  %314 = vmatpush3.msra.mxu0 %v45_v28 }
  0x3c   :  { %349 = vmatpush3.msra.mxu1 %v139_v29  ;;  %315 = vmatprep.subr.mxu0 %v44_v30 }
  0x3d   :  { %350 = vmatprep.subr.mxu1 %v138_v31  ;;  %316 = vmatpush3.msra.mxu0 %v44_v30 }
  0x3e   :  { %317 = vmatprep.mubr.f32.mxu0 %v40_v32  ;;  %351 = vmatpush3.msra.mxu1 %v138_v31 }
  0x3f   :  { %352 = vmatprep.mubr.f32.mxu1 %v41_v33  ;;  %318 = vmatmul.mubr.f32.vlgmr.msra.gmra.mxu0 %v42_v34 }
  0x40   :  { %353 = vmatmul.mubr.f32.vlgmr.msra.gmra.mxu1 %v43_v35 }
  0xff   :  { %v319_v36 = vpop.f32.mrf.mxu0 }
 0x100   :  { %v354_v37 = vpop.f32.mrf.mxu1  ;;  %136 = vst [vmem:[#allocation7 + $0x10] sm:$0xff] %v319_v36 }
 0x101   :  { %230 = vst [vmem:[#allocation7 + $0x18] sm:$0xff] %v354_v37  ;;  %v126_v38 = vpop.f32.mrf.mxu0 }
 0x102   :  { %v220_v39 = vpop.f32.mrf.mxu1  ;;  %135 = vst [vmem:[#allocation7] sm:$0xff] %v126_v38 }
 0x103   :  { %229 = vst [vmem:[#allocation7 + $0x8] sm:$0xff] %v220_v39 }
 0x104   :  { %413 = shalt.err (!%p410_p0)
}
 0x105   :  { %242 = dma.vmem_to_hbm [thread:$0]  %s237_s1, 512, %s467_s2, [#allocation4], %s429_s12, %s429_s12, %s430_s13  }
 0x106   :  { %426 = dma.done.wait [#allocation4], 512  }
 0x107   :  { %427 = vsyncadd [#allocation4], 4294966784 }
 0x108   :  { %246 = vsyncpa [#allocation3], 1 }
 0x109   :  { %247 = vsyncpa [#allocation6], 1 }
 0x10a   :  { %248 = vsyncpa [#allocation4], 1 }

</bundles_post_ra>
